<compile_context>
chip_gen: v6e
topology: v6e:2x2x1
jax: 0.10.0
libtpu: 0.0.40
codegen_flags: <defaults>
</compile_context>

<pallas_src>
import math

import jax
import jax.numpy as jnp
from jax.experimental import pallas as pl
from jax.experimental.pallas import tpu as pltpu

LEAKY_SLOPE = 0.01  # torch.nn.LeakyReLU default negative_slope


def _round_up(x, m):
    return (x + m - 1) // m * m


def _choose_tile_b(B):
    """Lane/sublane-friendly batch tile.

    Prefers >=2 tiles (so the parallel batch axis shards across v7x's two
    TensorCores), caps tiles at 1024 rows, and shrinks the tile until batch
    padding waste is small.
    """
    B8 = _round_up(B, 8)
    if B8 <= 16:
        return B8  # tiny batch: single tile, no point splitting
    t = min(1024, _round_up(pl.cdiv(B8, 2), 8))
    # Shrink (in sublane steps) until padding waste <= ~12.5% of the batch.
    while t > 8 and _round_up(B8, t) - B8 > max(B8 // 8, 8):
        t -= 8
    return max(t, 8)


def _prednet_fused_kernel(x_ref, w1_ref, b1_ref, w2_ref, b2_ref, o_ref):
    """Grid = (batch_tiles,).  All heads handled in one step.

    x_ref : [TILE_B, D]        bf16
    w1_ref: [D, PH]            bf16   (all heads' fc1 weights concatenated on N)
    b1_ref: [1, PH]            f32
    w2_ref: [PH, OUT_PAD]      bf16   (block-diagonal: head i rows -> head i cols)
    b2_ref: [1, OUT_PAD]       f32    (column-disjoint sum of all heads' b2)
    o_ref : [TILE_B, OUT_PAD]  f32    (written exactly once)
    """
    # fc1 for all heads at once: [TILE_B, D] @ [D, PH] -> f32, + bias
    h = jnp.dot(x_ref[...], w1_ref[...], preferred_element_type=jnp.float32)
    h = h + b1_ref[...]
    # LeakyReLU (negative_slope = 0.01); Dropout is identity in eval mode.
    h = jnp.where(h > 0, h, LEAKY_SLOPE * h)
    # fc2 for all heads at once via the block-diagonal W2.
    y = jnp.dot(h.astype(w2_ref.dtype), w2_ref[...],
                preferred_element_type=jnp.float32)
    o_ref[...] = y + b2_ref[...]


def init_prednet_params(key, input_dim, hidden_dim, num_props, cls_index):
    """Fused, bf16-weight params mimicking torch.nn.Linear default init.

    Builds:
      w1 : [D, PH_pad]        bf16  (concatenated per-head fc1 weights, zero-padded)
      b1 : [1, PH_pad]        f32
      w2 : [PH_pad, OUT_PAD]  bf16  (block-diagonal fc2 weights)
      b2 : [1, OUT_PAD]       f32   (disjoint-column sum of per-head fc2 biases)
    """
    P, D, H = num_props, input_dim, hidden_dim
    out_dims = [2 if i in cls_index else 1 for i in range(P)]
    offsets, off = [], 0
    for od in out_dims:
        offsets.append(off)
        off += od
    total_out = off
    out_pad = max(128, _round_up(total_out, 128))
    ph = P * H
    ph_pad = max(128, _round_up(ph, 128))

    w1 = jnp.zeros((D, ph_pad), jnp.float32)
    b1 = jnp.zeros((1, ph_pad), jnp.float32)
    w2 = jnp.zeros((ph_pad, out_pad), jnp.float32)
    b2 = jnp.zeros((1, out_pad), jnp.float32)

    for i in range(P):
        od, ofs = out_dims[i], offsets[i]
        key, k1, k2, k3, k4 = jax.random.split(key, 5)
        bound1 = 1.0 / math.sqrt(D)
        w1_i = jax.random.uniform(k1, (D, H), jnp.float32, -bound1, bound1)
        b1_i = jax.random.uniform(k2, (H,), jnp.float32, -bound1, bound1)
        bound2 = 1.0 / math.sqrt(H)
        w2_i = jax.random.uniform(k3, (H, od), jnp.float32, -bound2, bound2)
        b2_i = jax.random.uniform(k4, (od,), jnp.float32, -bound2, bound2)
        # Head i's fc1 occupies hidden columns [i*H, (i+1)*H); its fc2 maps only
        # those rows into its own (disjoint) output column range [ofs, ofs+od).
        w1 = w1.at[:, i * H:(i + 1) * H].set(w1_i)
        b1 = b1.at[0, i * H:(i + 1) * H].set(b1_i)
        w2 = w2.at[i * H:(i + 1) * H, ofs:ofs + od].set(w2_i)
        b2 = b2.at[0, ofs:ofs + od].set(b2_i)

    return dict(
        w1=w1.astype(jnp.bfloat16),   # [D, PH_pad]        bf16
        b1=b1,                         # [1, PH_pad]        f32
        w2=w2.astype(jnp.bfloat16),   # [PH_pad, OUT_PAD]  bf16
        b2=b2,                         # [1, OUT_PAD]       f32
        hidden_dim=H,
        out_dims=out_dims,
        offsets=offsets,
        out_pad=out_pad,
        ph_pad=ph_pad,
    )


def prednet_forward(x, params):
    """Returns a list of [B, out_dim_i] f32 arrays, matching PredNet.forward."""
    B, D = x.shape
    out_pad = params["out_pad"]
    ph_pad = params["ph_pad"]

    tile_b = _choose_tile_b(B)
    Bp = _round_up(B, tile_b)
    x_bf = x.astype(jnp.bfloat16)
    if Bp != B:
        x_bf = jnp.pad(x_bf, ((0, Bp - B), (0, 0)))

    y = pl.pallas_call(
        _prednet_fused_kernel,
        out_shape=jax.ShapeDtypeStruct((Bp, out_pad), jnp.float32),
        grid_spec=pl.GridSpec(
            grid=(Bp // tile_b,),
            in_specs=[
                # x: one batch tile per grid step
                pl.BlockSpec((tile_b, D), lambda b: (b, 0)),
                # fused weights/biases: constant block index -> DMA'd once, resident
                pl.BlockSpec((D, ph_pad), lambda b: (0, 0)),
                pl.BlockSpec((1, ph_pad), lambda b: (0, 0)),
                pl.BlockSpec((ph_pad, out_pad), lambda b: (0, 0)),
                pl.BlockSpec((1, out_pad), lambda b: (0, 0)),
            ],
            # lane-dense output slab, written exactly once per tile
            out_specs=pl.BlockSpec((tile_b, out_pad), lambda b: (b, 0)),
        ),
        compiler_params=pltpu.CompilerParams(
            dimension_semantics=("parallel",)),
    )(x_bf, params["w1"], params["b1"], params["w2"], params["b2"])

    outs = []
    for ofs, od in zip(params["offsets"], params["out_dims"]):
        outs.append(y[:B, ofs:ofs + od])
    return outs


def prednet_forward_ref(x, params):
    """Pure-JAX reference (same bf16 params, f32 accumulation)."""
    x_bf = x.astype(jnp.bfloat16)
    h = jnp.dot(x_bf, params["w1"], preferred_element_type=jnp.float32)
    h = h + params["b1"]
    h = jnp.where(h > 0, h, LEAKY_SLOPE * h)
    y = jnp.dot(h.astype(jnp.bfloat16), params["w2"],
                preferred_element_type=jnp.float32) + params["b2"]
    outs = []
    for ofs, od in zip(params["offsets"], params["out_dims"]):
        outs.append(y[:, ofs:ofs + od])
    return outs


def prednet_forward_ref_per_head(x, params):
    """Unfused per-head reference (mirrors the PyTorch loop) to validate the fusion."""
    H = params["hidden_dim"]
    x_bf = x.astype(jnp.bfloat16)
    outs = []
    for i, (ofs, od) in enumerate(zip(params["offsets"], params["out_dims"])):
        w1_i = params["w1"][:, i * H:(i + 1) * H]
        b1_i = params["b1"][:, i * H:(i + 1) * H]
        w2_i = params["w2"][i * H:(i + 1) * H, ofs:ofs + od]
        b2_i = params["b2"][:, ofs:ofs + od]
        h = jnp.dot(x_bf, w1_i, preferred_element_type=jnp.float32) + b1_i
        h = jnp.where(h > 0, h, LEAKY_SLOPE * h)
        outs.append(jnp.dot(h.astype(jnp.bfloat16), w2_i,
                            preferred_element_type=jnp.float32) + b2_i)
    return outs


if __name__ == "__main__":
    # Small shapes: batch=8, input_dim=32, hidden_dim=32, 3 heads (head 1 is a classifier).
    B, INPUT_DIM, HIDDEN_DIM = 8, 32, 32
    NUM_PROPS, CLS_INDEX = 3, [1]

    key = jax.random.PRNGKey(0)
    kx, kp = jax.random.split(key)
    x = jax.random.normal(kx, (B, INPUT_DIM), jnp.float32)
    params = init_prednet_params(kp, INPUT_DIM, HIDDEN_DIM, NUM_PROPS, CLS_INDEX)

    outs = prednet_forward(x, params)
    outs = [jax.block_until_ready(o) for o in outs]

    refs = prednet_forward_ref(x, params)
    refs_ph = prednet_forward_ref_per_head(x, params)
    for i, (o, r, rp, od) in enumerate(
            zip(outs, refs, refs_ph, params["out_dims"])):
        assert o.shape == (B, od), (i, o.shape, od)
        assert jnp.allclose(o, r, atol=2e-3, rtol=2e-3), f"head {i} mismatch vs fused ref"
        assert jnp.allclose(o, rp, atol=2e-3, rtol=2e-3), f"head {i} mismatch vs per-head ref"

    print("KERNEL_OK")
</pallas_src>

<mosaic_0001>
module attributes {stable_mosaic.version = 11 : i64} {
  func.func @_prednet_fused_kernel(%arg0: i32, %arg1: memref<8x32xbf16, #tpu.memory_space<vmem>>, %arg2: memref<32x128xbf16, #tpu.memory_space<vmem>>, %arg3: memref<1x128xf32, #tpu.memory_space<vmem>>, %arg4: memref<128x128xbf16, #tpu.memory_space<vmem>>, %arg5: memref<1x128xf32, #tpu.memory_space<vmem>>, %arg6: memref<8x128xf32, #tpu.memory_space<vmem>>) attributes {dimension_semantics = [#tpu.dimension_semantics<parallel>], iteration_bounds = array<i64: 1>, scalar_prefetch = 0 : i64, scratch_operands = 0 : i64, tpu.core_type = #tpu.core_type<tc>, window_params = [{transform_indices = @transform_0, window_bounds = array<i64: 8, 32>}, {pipeline_mode = #tpu.pipeline_mode<synchronous>, transform_indices = @transform_1, window_bounds = array<i64: 32, 128>}, {pipeline_mode = #tpu.pipeline_mode<synchronous>, transform_indices = @transform_2, window_bounds = array<i64: 1, 128>}, {pipeline_mode = #tpu.pipeline_mode<synchronous>, transform_indices = @transform_3, window_bounds = array<i64: 128, 128>}, {pipeline_mode = #tpu.pipeline_mode<synchronous>, transform_indices = @transform_4, window_bounds = array<i64: 1, 128>}, {transform_indices = @transform_5, window_bounds = array<i64: 8, 128>}]} {
    %c0 = arith.constant 0 : index
    %c0_0 = arith.constant 0 : index
    %0 = vector.load %arg1[%c0, %c0_0] : memref<8x32xbf16, #tpu.memory_space<vmem>>, vector<8x32xbf16>
    %c0_1 = arith.constant 0 : index
    %c0_2 = arith.constant 0 : index
    %1 = vector.load %arg2[%c0_1, %c0_2] : memref<32x128xbf16, #tpu.memory_space<vmem>>, vector<32x128xbf16>
    %cst = arith.constant dense<0.000000e+00> : vector<8x128xf32>
    %2 = tpu.matmul %0, %1, %cst {dimension_numbers = #tpu.dot_dimension_numbers<[1], [0], [0], [1], [0, 0, 1, 1], [], []>} : vector<8x32xbf16>, vector<32x128xbf16>, vector<8x128xf32> -> vector<8x128xf32>
    %c0_3 = arith.constant 0 : index
    %c0_4 = arith.constant 0 : index
    %3 = vector.load %arg3[%c0_3, %c0_4] : memref<1x128xf32, #tpu.memory_space<vmem>>, vector<1x128xf32>
    %4 = vector.broadcast %3 : vector<1x128xf32> to vector<8x128xf32>
    %5 = arith.addf %2, %4 : vector<8x128xf32>
    %cst_5 = arith.constant 0.000000e+00 : f32
    %6 = vector.broadcast %cst_5 : f32 to vector<8x128xf32>
    %7 = arith.cmpf ogt, %5, %6 : vector<8x128xf32>
    %cst_6 = arith.constant 0.00999999977 : f32
    %8 = vector.broadcast %cst_6 : f32 to vector<8x128xf32>
    %9 = arith.mulf %8, %5 : vector<8x128xf32>
    %10 = arith.select %7, %5, %9 : vector<8x128xi1>, vector<8x128xf32>
    %11 = arith.truncf %10 : vector<8x128xf32> to vector<8x128xbf16>
    %c0_7 = arith.constant 0 : index
    %c0_8 = arith.constant 0 : index
    %12 = vector.load %arg4[%c0_7, %c0_8] : memref<128x128xbf16, #tpu.memory_space<vmem>>, vector<128x128xbf16>
    %cst_9 = arith.constant dense<0.000000e+00> : vector<8x128xf32>
    %13 = tpu.matmul %11, %12, %cst_9 {dimension_numbers = #tpu.dot_dimension_numbers<[1], [0], [0], [1], [0, 0, 1, 1], [], []>} : vector<8x128xbf16>, vector<128x128xbf16>, vector<8x128xf32> -> vector<8x128xf32>
    %c0_10 = arith.constant 0 : index
    %c0_11 = arith.constant 0 : index
    %14 = vector.load %arg5[%c0_10, %c0_11] : memref<1x128xf32, #tpu.memory_space<vmem>>, vector<1x128xf32>
    %15 = vector.broadcast %14 : vector<1x128xf32> to vector<8x128xf32>
    %16 = arith.addf %13, %15 : vector<8x128xf32>
    %c0_12 = arith.constant 0 : index
    %c0_13 = arith.constant 0 : index
    %17 = vector.load %arg6[%c0_12, %c0_13] : memref<8x128xf32, #tpu.memory_space<vmem>>, vector<8x128xf32>
    tpu.vector_store %arg6[%c0_12, %c0_13], %16 {strides = array<i32>} : memref<8x128xf32, #tpu.memory_space<vmem>>, vector<8x128xf32>,
    return
  }
  func.func @transform_0(%arg0: i32) -> (i32, i32) {
    %c0_i32 = arith.constant 0 : i32
    %c0_i32_0 = arith.constant 0 : i32
    return %arg0, %c0_i32 : i32, i32
  }
  func.func @transform_1(%arg0: i32) -> (i32, i32) {
    %c0_i32 = arith.constant 0 : i32
    %c0_i32_0 = arith.constant 0 : i32
    %c0_i32_1 = arith.constant 0 : i32
    return %c0_i32, %c0_i32_0 : i32, i32
  }
  func.func @transform_2(%arg0: i32) -> (i32, i32) {
    %c0_i32 = arith.constant 0 : i32
    %c0_i32_0 = arith.constant 0 : i32
    %c0_i32_1 = arith.constant 0 : i32
    return %c0_i32, %c0_i32_0 : i32, i32
  }
  func.func @transform_3(%arg0: i32) -> (i32, i32) {
    %c0_i32 = arith.constant 0 : i32
    %c0_i32_0 = arith.constant 0 : i32
    %c0_i32_1 = arith.constant 0 : i32
    return %c0_i32, %c0_i32_0 : i32, i32
  }
  func.func @transform_4(%arg0: i32) -> (i32, i32) {
    %c0_i32 = arith.constant 0 : i32
    %c0_i32_0 = arith.constant 0 : i32
    %c0_i32_1 = arith.constant 0 : i32
    return %c0_i32, %c0_i32_0 : i32, i32
  }
  func.func @transform_5(%arg0: i32) -> (i32, i32) {
    %c0_i32 = arith.constant 0 : i32
    %c0_i32_0 = arith.constant 0 : i32
    return %arg0, %c0_i32 : i32, i32
  }
}

</mosaic_0001>

<bundles_post_ra>
// kernel: tpu_custom_call.1
= control target key start
LH: loop header
LB: loop body
LE: loop exit
PB: predicated region body
PF: predicated region fallthrough
CT: control target
= control target key end

     0   :  { %10 = vsyncpa [#allocation3], 0  ;;  %s474_s0 = inlined_call_operand.hbm [shape: bf16[8,32], index: 0, kind: input, shape index: {}]   ;;  %s475_s1 = inlined_call_operand.hbm [shape: bf16[32,128], index: 1, kind: input, shape index: {}]   ;;  %s476_s2 = inlined_call_operand.vmem [shape: f32[1,128], index: 2, kind: input, shape index: {}]   ;;  %s477_s3 = inlined_call_operand.hbm [shape: bf16[128,128], index: 3, kind: input, shape index: {}]   ;;  %s478_s4 = inlined_call_operand.vmem [shape: f32[1,128], index: 4, kind: input, shape index: {}]   ;;  %s479_s5 = inlined_call_operand.hbm [shape: f32[8,128], index: 5, kind: output, shape index: {}]  }
   0x1   :  { %11 = vsyncpa [#allocation6], 0 }
   0x2   :  { %12 = vsyncpa [#allocation4], 0  ;;  %s418_s18 = smov [#allocation5]  }
   0x3   :  { %s28_s19 = sshll.u32 %s418_s18, 4  ;;  %s29_s19 = int_to_ptr.vmem [resolvable:$true] %s28_s19 }
   0x4   :  { %s340_s20 = scalar_lea.vmem %s29_s19, 256  ;;  %p345_p1 = scmp.lt.s32.totalorder %s29_s19, %s29_s19 }
   0x5   :  { %p341_p0 = scmp.ne.s32.totalorder %s29_s19, %s340_s20  ;;  %p346_p2 = scmp.lt.s32.totalorder %s340_s20, %s340_s20 }
   0x7   :  { %p347_p3 = por %p346_p2, %p345_p1 }
   0x9   :  { %p348_p4 = pnand %p347_p3, %p341_p0 }
   0xb   :  { %351 = shalt.err (!%p348_p4)
}
   0xc   :  { %s419_s21 = smov 64   ;;  %s420_s22 = smov 4  }
   0xd   :  { %34 = dma.hbm_to_vmem [thread:$0]  %s475_s1, 256, %s29_s19, [#allocation6], %s419_s21, %s419_s21, %s420_s22  }
   0xe   :  { %s421_s25 = smov [#allocation2]   ;;  %s422_s27 = smov [#allocation7]  }
   0xf   :  { %s19_s26 = sshll.u32 %s421_s25, 4  ;;  %s42_s28 = sshll.u32 %s422_s27, 4  ;;  %s20_s26 = int_to_ptr.vmem [resolvable:$true] %s19_s26  ;;  %s43_s28 = int_to_ptr.vmem [resolvable:$true] %s42_s28 }
  0x10   :  { %s360_s29 = scalar_lea.vmem %s20_s26, 64  ;;  %p365_p6 = scmp.lt.s32.totalorder %s20_s26, %s20_s26 }
  0x11   :  { %p361_p5 = scmp.ne.s32.totalorder %s20_s26, %s360_s29  ;;  %p366_p7 = scmp.lt.s32.totalorder %s360_s29, %s360_s29 }
  0x13   :  { %p367_p8 = por %p366_p7, %p365_p6 }
  0x15   :  { %p368_p9 = pnand %p367_p8, %p361_p5 }
  0x17   :  { %371 = shalt.err (!%p368_p9)
}
  0x18   :  { %22 = dma.hbm_to_vmem [thread:$0]  %s474_s0, 64, %s20_s26, [#allocation3]  }
  0x19   :  { %s380_s7 = scalar_lea.vmem %s43_s28, 1024  ;;  %p385_p11 = scmp.lt.s32.totalorder %s43_s28, %s43_s28 }
  0x1a   :  { %p381_p10 = scmp.ne.s32.totalorder %s43_s28, %s380_s7  ;;  %p386_p12 = scmp.lt.s32.totalorder %s380_s7, %s380_s7 }
  0x1c   :  { %p387_p13 = por %p386_p12, %p385_p11 }
  0x1e   :  { %p388_p0 = pnand %p387_p13, %p381_p10 }
  0x20   :  { %391 = shalt.err (!%p388_p0)
}
  0x21   :  { %48 = dma.hbm_to_vmem [thread:$0]  %s477_s3, 1024, %s43_s28, [#allocation6], %s419_s21, %s419_s21, %s420_s22  }
  0x22   :  { %412 = dma.done.wait [#allocation3], 64  }
  0x23   :  { %413 = vsyncadd [#allocation3], 4294967232 }
  0x24   :  { %414 = dma.done.wait [#allocation6], 1280  }
  0x25   :  { %415 = vsyncadd [#allocation6], 4294966016  ;;  %v423_v0 = vmov 0.0   ;;  %vm424_vm0 = vmmov 0   ;;  %v322_v1 = vld [vmem:[#allocation5 + $0x8] sm:$0xff]   ;;  %v323_v2 = vld [vmem:[#allocation5] sm:$0xff]  }
  0x26   :  { %286 = vmatprep.subr.bf16.mxu0 %v423_v0  ;;  %290 = vmatprep.mubr.msk.bf16.mxu0 %vm424_vm0, %v423_v0  ;;  %v324_v3 = vld [vmem:[#allocation7 + $0x38] sm:$0xff]   ;;  %vm85_vm1 = vcmask 261120   ;;  %v325_v4 = vld [vmem:[#allocation7 + $0x30] sm:$0xff]   ;;  %v61_v5 = vld [vmem:[#allocation2] sm:$0xf]  ;;  %s425_s11 = smov [#allocation8]  }
  0x27   :  { %294 = vmatprep.subr.bf16.mxu1 %v423_v0  ;;  %310 = vmatprep.mubr.msk.bf16.mxu1 %vm424_vm0, %v423_v0  ;;  %v326_v6 = vld [vmem:[#allocation7 + $0x28] sm:$0xff]   ;;  %v327_v7 = vld [vmem:[#allocation7 + $0x20] sm:$0xff]   ;;  %v328_v8 = vld [vmem:[#allocation7 + $0x18] sm:$0xff]   ;;  %s251_s12 = sshll.u32 %s425_s11, 4  ;;  %s252_s12 = int_to_ptr.vmem [resolvable:$true] %s251_s12 }
  0x28   :  { %287 = vmatpush3.bf16.msra.mxu0 %v322_v1  ;;  %295 = vmatpush3.bf16.msra.mxu1 %v324_v3  ;;  %v329_v9 = vld [vmem:[#allocation7 + $0x10] sm:$0xff]   ;;  %v330_v10 = vld [vmem:[#allocation7 + $0x8] sm:$0xff]   ;;  %v331_v11 = vld [vmem:[#allocation7] sm:$0xff]   ;;  %p397_p2 = scmp.lt.s32.totalorder %s252_s12, %s252_s12 }
  0x29   :  { %288 = vmatprep.subr.bf16.mxu0 %v423_v0  ;;  %296 = vmatprep.subr.bf16.mxu1 %v423_v0  ;;  %v261_v12 = vld [vmem:[%s476_s2] ss:$0 sm:$0xff]  ;;  %s392_s2 = scalar_lea.vmem %s252_s12, 128 }
  0x2a   :  { %v265_v21 = vld [vmem:[%s478_s4] ss:$0 sm:$0xff]  ;;  %p393_p1 = scmp.ne.s32.totalorder %s252_s12, %s392_s2  ;;  %p398_p3 = scmp.lt.s32.totalorder %s392_s2, %s392_s2 }
  0x2c   :  { %289 = vmatpush3.bf16.msra.mxu0 %v323_v2  ;;  %297 = vmatpush3.bf16.msra.mxu1 %v325_v4  ;;  %p399_p4 = por %p398_p3, %p397_p2 }
  0x2d   :  { %298 = vmatprep.subr.bf16.mxu1 %v423_v0 }
  0x2e   :  { %p400_p5 = pnand %p399_p4, %p393_p1 }
  0x2f   :  { %291 = vmatmul.mubr.msk.bf16.vlgmr.msra.gmra.mxu0 %vm85_vm1, %v61_v5 }
  0x30   :  { %299 = vmatpush3.bf16.msra.mxu1 %v326_v6 }
  0x31   :  { %300 = vmatprep.subr.bf16.mxu1 %v423_v0 }
  0x34   :  { %301 = vmatpush3.bf16.msra.mxu1 %v327_v7 }
  0x35   :  { %302 = vmatprep.subr.bf16.mxu1 %v423_v0 }
  0x38   :  { %303 = vmatpush3.bf16.msra.mxu1 %v328_v8 }
  0x39   :  { %304 = vmatprep.subr.bf16.mxu1 %v423_v0 }
  0x3c   :  { %305 = vmatpush3.bf16.msra.mxu1 %v329_v9 }
  0x3d   :  { %306 = vmatprep.subr.bf16.mxu1 %v423_v0 }
  0x40   :  { %307 = vmatpush3.bf16.msra.mxu1 %v330_v10 }
  0x41   :  { %308 = vmatprep.subr.bf16.mxu1 %v423_v0 }
  0x44   :  { %309 = vmatpush3.bf16.msra.mxu1 %v331_v11 }
  0xef   :  { %v123_v13 = vpop.f32.mrf.mxu0 }
  0xf0   :  { %v124_v14 = vadd.f32 %v261_v12, %v123_v13 }
  0xf1   :  { %v292_v15 = vpop.f32.mrf.mxu0 }
  0xf2   :  { %vm129_vm2 = vcmp.gt.f32.partialorder %v124_v14, 0.0  ;;  %v130_v16 = vmul.f32 0.01, %v124_v14 }
  0xf3   :  { %v126_v17 = vpop.f32.mrf.mxu0 }
  0xf4   :  { %v131_v18 = vsel %vm129_vm2, %v124_v14, %v130_v16 }
  0xf5   :  { %v293_v19 = vpop.f32.mrf.mxu0  ;;  %v132_v20 = vpack.c.bf16 %v131_v18, %v131_v18 }
  0xf7   :  { %311 = vmatmul.mubr.bf16.vlgmr.msra.gmra.mxu1 %v132_v20 }
 0x1b7   :  { %v238_v22 = vpop.f32.mrf.mxu1 }
 0x1b8   :  { %v239_v23 = vadd.f32 %v265_v21, %v238_v22 }
 0x1b9   :  { %v312_v24 = vpop.f32.mrf.mxu1 }
 0x1ba   :  { %244 = vst [vmem:[#allocation8] sm:$0xff] %v239_v23 }
 0x1bb   :  { %v241_v25 = vpop.f32.mrf.mxu1 }
 0x1bc   :  { %403 = shalt.err (!%p400_p5)
}
 0x1bd   :  { %254 = dma.vmem_to_hbm [thread:$0]  %s252_s12, 128, %s479_s5, [#allocation4]   ;;  %v313_v26 = vpop.f32.mrf.mxu1 }
 0x1be   :  { %416 = dma.done.wait [#allocation4], 128  }
 0x1bf   :  { %417 = vsyncadd [#allocation4], 4294967168 }
 0x1c0   :  { %258 = vsyncpa [#allocation3], 1 }
 0x1c1   :  { %259 = vsyncpa [#allocation6], 1 }
 0x1c2   :  { %260 = vsyncpa [#allocation4], 1 }

</bundles_post_ra>
